<compile_context>
chip_gen: v7x
topology: tpu7x:2x2x1
jax: 0.10.0
libtpu: 0.0.40
codegen_flags: <defaults>
</compile_context>

<pallas_src>
import functools

import jax
import jax.numpy as jnp
from jax import lax
from jax.experimental import pallas as pl
from jax.experimental.pallas import tpu as pltpu


def _bilstm_fc_kernel(x_ref, wih_ref, b_ref, whh_ref, fcw_ref, fcb_ref, o_ref):
    """Whole forward pass in one kernel (no grid).

    x_ref   : (T, E)     input sequence (batch squeezed)
    wih_ref : (E, 8H)    input->gate weights, columns [fwd i,f,g,o | bwd i,f,g,o]
    b_ref   : (1, 8H)    combined b_ih + b_hh, same column order as wih_ref
    whh_ref : (2H, 8H)   block-diagonal recurrent weights; rows = [h_fwd | h_bwd],
                         columns gate-interleaved: [i_f i_b f_f f_b g_f g_b o_f o_b]
    fcw_ref : (2H, C)    fc weight (pre-transposed)
    fcb_ref : (1, C)     fc bias
    o_ref   : (T, C)     logits
    """
    T = x_ref.shape[0]
    H = whh_ref.shape[0] // 2
    G = 2 * H  # width of one combined (fwd+bwd) gate slab

    x = x_ref[...]
    wih = wih_ref[...]
    b = b_ref[...]
    whh = whh_ref[...]

    # Input projection for both directions and all timesteps: one MXU matmul.
    xproj = jnp.dot(x, wih, preferred_element_type=jnp.float32) + b       # (T, 8H)
    xp_f = xproj[:, : 4 * H]                                              # (T, 4H)
    xp_b = xproj[:, 4 * H:]                                               # (T, 4H)

    # One-time prep (outside the recurrence): time-reverse the backward half and
    # interleave gate columns so each combined gate is a contiguous 2H-wide slab
    # in order [i_f i_b | f_f f_b | g_f g_b | o_f o_b].  T is static -> all static
    # slices, cost is paid once, not per step.
    xp_b_rev = jnp.concatenate(
        [xp_b[T - 1 - t:T - t, :] for t in range(T)], axis=0)             # (T, 4H)
    xg = jnp.concatenate(
        [blk
         for g in range(4)
         for blk in (xp_f[:, g * H:(g + 1) * H], xp_b_rev[:, g * H:(g + 1) * H])],
        axis=-1)                                                          # (T, 8H)

    # Fully unrolled recurrence.  One recurrent MXU push per step drives BOTH
    # directions via the block-diagonal whh; state vectors are (1, 2H) [fwd|bwd].
    h = jnp.zeros((1, 2 * H), jnp.float32)
    c = jnp.zeros((1, 2 * H), jnp.float32)
    fwd_h = [None] * T
    bwd_h = [None] * T
    for t in range(T):  # static unroll (T known at trace time)
        gates = xg[t:t + 1, :] + jnp.dot(h, whh, preferred_element_type=jnp.float32)
        i_g = jax.nn.sigmoid(gates[:, 0 * G:1 * G])
        f_g = jax.nn.sigmoid(gates[:, 1 * G:2 * G])
        g_g = jnp.tanh(gates[:, 2 * G:3 * G])
        o_g = jax.nn.sigmoid(gates[:, 3 * G:4 * G])
        c = f_g * c + i_g * g_g
        h = o_g * jnp.tanh(c)
        fwd_h[t] = h[:, :H]            # forward hidden for original time t
        bwd_h[T - 1 - t] = h[:, H:]    # backward hidden for original time T-1-t

    # (T, 2H) per-timestep [h_fwd, h_bwd] concat -- stays in vregs, no HBM trip.
    lstm_out = jnp.concatenate(
        [jnp.concatenate(fwd_h, axis=0), jnp.concatenate(bwd_h, axis=0)], axis=-1)

    # Final Linear fused into the same kernel; single (T, C) store.
    o_ref[...] = (jnp.dot(lstm_out, fcw_ref[...], preferred_element_type=jnp.float32)
                  + fcb_ref[...])


def init_params(key, embedding_size, hidden_size, num_classes):
    """Random parameters in PyTorch layout (gate order i, f, g, o)."""
    E, H, C = embedding_size, hidden_size, num_classes
    ks = jax.random.split(key, 6)
    scale = 1.0 / jnp.sqrt(jnp.float32(H))

    def u(k, shape):
        return jax.random.uniform(k, shape, jnp.float32, -scale, scale)

    return {
        "w_ih": u(ks[0], (2, 4 * H, E)),   # per-direction, torch layout
        "w_hh": u(ks[1], (2, 4 * H, H)),
        "b_ih": u(ks[2], (2, 4 * H)),
        "b_hh": u(ks[3], (2, 4 * H)),
        "fc_w": u(ks[4], (C, 2 * H)),
        "fc_b": u(ks[5], (C,)),
    }


def pack_params(raw):
    """Repack PyTorch-layout weights into the fused kernel layout."""
    w_ih, w_hh = raw["w_ih"], raw["w_hh"]
    b_ih, b_hh = raw["b_ih"], raw["b_hh"]
    H = w_hh.shape[-1]

    wih_f_t, wih_b_t = w_ih[0].T, w_ih[1].T            # (E, 4H) each, cols i,f,g,o
    wih_comb = jnp.concatenate([wih_f_t, wih_b_t], axis=-1)           # (E, 8H)
    b_comb = jnp.concatenate([b_ih[0] + b_hh[0], b_ih[1] + b_hh[1]])[None, :]  # (1, 8H)

    # Block-diagonal recurrent weight: rows [h_fwd | h_bwd],
    # columns gate-interleaved [i_f i_b f_f f_b g_f g_b o_f o_b].
    whh_f_t, whh_b_t = w_hh[0].T, w_hh[1].T            # (H, 4H) each, cols i,f,g,o
    Z = jnp.zeros((H, H), jnp.float32)
    cols = []
    for g in range(4):
        cols.append(jnp.concatenate([whh_f_t[:, g * H:(g + 1) * H], Z], axis=0))
        cols.append(jnp.concatenate([Z, whh_b_t[:, g * H:(g + 1) * H]], axis=0))
    whh_comb = jnp.concatenate(cols, axis=1)                           # (2H, 8H)

    return {
        "wih_comb": wih_comb,
        "b_comb": b_comb,
        "whh_comb": whh_comb,
        "fc_w_t": raw["fc_w"].T,          # (2H, C)
        "fc_b": raw["fc_b"][None, :],     # (1, C)
    }


@jax.jit
def lstm_classifier_forward(embedding, packed):
    # embedding: (T, 1, E) — seq-first, batch=1 (as implied by init_hidden()).
    T, B, E = embedding.shape
    H = packed["whh_comb"].shape[0] // 2
    C = packed["fc_b"].shape[-1]
    x = embedding.reshape(T, E)

    vmem = pl.BlockSpec(memory_space=pltpu.MemorySpace.VMEM)
    logits = pl.pallas_call(
        _bilstm_fc_kernel,
        out_shape=jax.ShapeDtypeStruct((T, C), jnp.float32),
        in_specs=[vmem] * 6,
        out_specs=vmem,
    )(x, packed["wih_comb"], packed["b_comb"], packed["whh_comb"],
      packed["fc_w_t"], packed["fc_b"])

    return logits.reshape(T, B, C)   # (T, 1, C), matching torch output shape


def _reference_forward(embedding, raw):
    """Pure-JAX reference (PyTorch bidirectional-LSTM semantics, zero init state)."""
    w_ih, w_hh = raw["w_ih"], raw["w_hh"]
    b = raw["b_ih"] + raw["b_hh"]
    T, B, E = embedding.shape
    H = w_hh.shape[-1]
    x = embedding.reshape(T, E)
    hi = jax.lax.Precision.HIGHEST

    def run_dir(d, xs):
        def step(carry, xt):
            h, c = carry
            g = (jnp.dot(xt, w_ih[d].T, precision=hi) + b[d]
                 + jnp.dot(h, w_hh[d].T, precision=hi))
            i = jax.nn.sigmoid(g[0:H])
            f = jax.nn.sigmoid(g[H:2 * H])
            gg = jnp.tanh(g[2 * H:3 * H])
            o = jax.nn.sigmoid(g[3 * H:4 * H])
            c = f * c + i * gg
            h = o * jnp.tanh(c)
            return (h, c), h

        (_, _), hs = lax.scan(step, (jnp.zeros(H), jnp.zeros(H)), xs)
        return hs

    h_f = run_dir(0, x)                 # (T, H)
    h_b = run_dir(1, x[::-1])[::-1]     # (T, H) back in original time order
    lstm_out = jnp.concatenate([h_f, h_b], axis=-1)
    logits = jnp.dot(lstm_out, raw["fc_w"].T, precision=hi) + raw["fc_b"]
    return logits.reshape(T, B, -1)


if __name__ == "__main__":
    embedding_size = 16
    hidden_size = 32
    num_classes = 4
    seq_len = 8
    batch = 1  # fixed by the module's init_hidden()

    key = jax.random.PRNGKey(0)
    k_param, k_input = jax.random.split(key)
    raw = init_params(k_param, embedding_size, hidden_size, num_classes)
    packed = pack_params(raw)
    embedding = jax.random.normal(
        k_input, (seq_len, batch, embedding_size), jnp.float32
    )

    out = lstm_classifier_forward(embedding, packed)
    jax.block_until_ready(out)
    assert out.shape == (seq_len, batch, num_classes), out.shape

    ref = _reference_forward(embedding, raw)
    assert jnp.allclose(out, ref, atol=2e-3, rtol=2e-3), float(
        jnp.max(jnp.abs(out - ref))
    )
    print("KERNEL_OK")
</pallas_src>

<mosaic_0001>
module attributes {stable_mosaic.version = 11 : i64} {
  func.func @_bilstm_fc_kernel(%arg0: memref<8x16xf32, #tpu.memory_space<vmem>>, %arg1: memref<16x256xf32, #tpu.memory_space<vmem>>, %arg2: memref<1x256xf32, #tpu.memory_space<vmem>>, %arg3: memref<64x256xf32, #tpu.memory_space<vmem>>, %arg4: memref<64x4xf32, #tpu.memory_space<vmem>>, %arg5: memref<1x4xf32, #tpu.memory_space<vmem>>, %arg6: memref<8x4xf32, #tpu.memory_space<vmem>>) attributes {dimension_semantics = [], scalar_prefetch = 0 : i64, scratch_operands = 0 : i64, tpu.core_type = #tpu.core_type<tc>} {
    %c0 = arith.constant 0 : index
    %c0_0 = arith.constant 0 : index
    %0 = vector.load %arg0[%c0, %c0_0] : memref<8x16xf32, #tpu.memory_space<vmem>>, vector<8x16xf32>
    %c0_1 = arith.constant 0 : index
    %c0_2 = arith.constant 0 : index
    %1 = vector.load %arg1[%c0_1, %c0_2] : memref<16x256xf32, #tpu.memory_space<vmem>>, vector<16x256xf32>
    %c0_3 = arith.constant 0 : index
    %c0_4 = arith.constant 0 : index
    %2 = vector.load %arg2[%c0_3, %c0_4] : memref<1x256xf32, #tpu.memory_space<vmem>>, vector<1x256xf32>
    %c0_5 = arith.constant 0 : index
    %c0_6 = arith.constant 0 : index
    %3 = vector.load %arg3[%c0_5, %c0_6] : memref<64x256xf32, #tpu.memory_space<vmem>>, vector<64x256xf32>
    %cst = arith.constant dense<0.000000e+00> : vector<8x256xf32>
    %4 = tpu.matmul %0, %1, %cst {dimension_numbers = #tpu.dot_dimension_numbers<[1], [0], [0], [1], [0, 0, 1, 1], [], []>} : vector<8x16xf32>, vector<16x256xf32>, vector<8x256xf32> -> vector<8x256xf32>
    %5 = vector.broadcast %2 : vector<1x256xf32> to vector<8x256xf32>
    %6 = arith.addf %4, %5 : vector<8x256xf32>
    %7 = vector.extract_strided_slice %6 {offsets = [0, 0], sizes = [8, 128], strides = [1, 1]} : vector<8x256xf32> to vector<8x128xf32>
    %8 = vector.extract_strided_slice %6 {offsets = [0, 128], sizes = [8, 128], strides = [1, 1]} : vector<8x256xf32> to vector<8x128xf32>
    %9 = vector.extract_strided_slice %8 {offsets = [7, 0], sizes = [1, 128], strides = [1, 1]} : vector<8x128xf32> to vector<1x128xf32>
    %10 = vector.extract_strided_slice %8 {offsets = [6, 0], sizes = [1, 128], strides = [1, 1]} : vector<8x128xf32> to vector<1x128xf32>
    %11 = vector.extract_strided_slice %8 {offsets = [5, 0], sizes = [1, 128], strides = [1, 1]} : vector<8x128xf32> to vector<1x128xf32>
    %12 = vector.extract_strided_slice %8 {offsets = [4, 0], sizes = [1, 128], strides = [1, 1]} : vector<8x128xf32> to vector<1x128xf32>
    %13 = vector.extract_strided_slice %8 {offsets = [3, 0], sizes = [1, 128], strides = [1, 1]} : vector<8x128xf32> to vector<1x128xf32>
    %14 = vector.extract_strided_slice %8 {offsets = [2, 0], sizes = [1, 128], strides = [1, 1]} : vector<8x128xf32> to vector<1x128xf32>
    %15 = vector.extract_strided_slice %8 {offsets = [1, 0], sizes = [1, 128], strides = [1, 1]} : vector<8x128xf32> to vector<1x128xf32>
    %16 = vector.extract_strided_slice %8 {offsets = [0, 0], sizes = [1, 128], strides = [1, 1]} : vector<8x128xf32> to vector<1x128xf32>
    %17 = tpu.concatenate %9, %10, %11, %12, %13, %14, %15, %16 in 0 : vector<1x128xf32>, vector<1x128xf32>, vector<1x128xf32>, vector<1x128xf32>, vector<1x128xf32>, vector<1x128xf32>, vector<1x128xf32>, vector<1x128xf32> -> vector<8x128xf32>
    %18 = vector.extract_strided_slice %7 {offsets = [0, 0], sizes = [8, 32], strides = [1, 1]} : vector<8x128xf32> to vector<8x32xf32>
    %19 = vector.extract_strided_slice %17 {offsets = [0, 0], sizes = [8, 32], strides = [1, 1]} : vector<8x128xf32> to vector<8x32xf32>
    %20 = vector.extract_strided_slice %7 {offsets = [0, 32], sizes = [8, 32], strides = [1, 1]} : vector<8x128xf32> to vector<8x32xf32>
    %21 = vector.extract_strided_slice %17 {offsets = [0, 32], sizes = [8, 32], strides = [1, 1]} : vector<8x128xf32> to vector<8x32xf32>
    %22 = vector.extract_strided_slice %7 {offsets = [0, 64], sizes = [8, 32], strides = [1, 1]} : vector<8x128xf32> to vector<8x32xf32>
    %23 = vector.extract_strided_slice %17 {offsets = [0, 64], sizes = [8, 32], strides = [1, 1]} : vector<8x128xf32> to vector<8x32xf32>
    %24 = vector.extract_strided_slice %7 {offsets = [0, 96], sizes = [8, 32], strides = [1, 1]} : vector<8x128xf32> to vector<8x32xf32>
    %25 = vector.extract_strided_slice %17 {offsets = [0, 96], sizes = [8, 32], strides = [1, 1]} : vector<8x128xf32> to vector<8x32xf32>
    %26 = tpu.concatenate %18, %19, %20, %21, %22, %23, %24, %25 in 1 : vector<8x32xf32>, vector<8x32xf32>, vector<8x32xf32>, vector<8x32xf32>, vector<8x32xf32>, vector<8x32xf32>, vector<8x32xf32>, vector<8x32xf32> -> vector<8x256xf32>
    %cst_7 = arith.constant 0.000000e+00 : f32
    %27 = vector.broadcast %cst_7 : f32 to vector<1x64xf32>
    %cst_8 = arith.constant 0.000000e+00 : f32
    %28 = vector.broadcast %cst_8 : f32 to vector<1x64xf32>
    %29 = vector.extract_strided_slice %26 {offsets = [0, 0], sizes = [1, 256], strides = [1, 1]} : vector<8x256xf32> to vector<1x256xf32>
    %cst_9 = arith.constant dense<0.000000e+00> : vector<1x256xf32>
    %30 = tpu.matmul %27, %3, %cst_9 {dimension_numbers = #tpu.dot_dimension_numbers<[1], [0], [0], [1], [0, 0, 1, 1], [], []>} : vector<1x64xf32>, vector<64x256xf32>, vector<1x256xf32> -> vector<1x256xf32>
    %31 = arith.addf %29, %30 : vector<1x256xf32>
    %32 = vector.extract_strided_slice %31 {offsets = [0, 0], sizes = [1, 64], strides = [1, 1]} : vector<1x256xf32> to vector<1x64xf32>
    %33 = arith.negf %32 : vector<1x64xf32>
    %34 = math.exp %33 : vector<1x64xf32>
    %cst_10 = arith.constant 1.000000e+00 : f32
    %35 = vector.broadcast %cst_10 : f32 to vector<1x64xf32>
    %36 = arith.addf %35, %34 : vector<1x64xf32>
    %37 = arith.divf %35, %36 : vector<1x64xf32>
    %38 = vector.extract_strided_slice %31 {offsets = [0, 64], sizes = [1, 64], strides = [1, 1]} : vector<1x256xf32> to vector<1x64xf32>
    %39 = arith.negf %38 : vector<1x64xf32>
    %40 = math.exp %39 : vector<1x64xf32>
    %cst_11 = arith.constant 1.000000e+00 : f32
    %41 = vector.broadcast %cst_11 : f32 to vector<1x64xf32>
    %42 = arith.addf %41, %40 : vector<1x64xf32>
    %43 = arith.divf %41, %42 : vector<1x64xf32>
    %44 = vector.extract_strided_slice %31 {offsets = [0, 128], sizes = [1, 64], strides = [1, 1]} : vector<1x256xf32> to vector<1x64xf32>
    %45 = math.tanh %44 : vector<1x64xf32>
    %46 = vector.extract_strided_slice %31 {offsets = [0, 192], sizes = [1, 64], strides = [1, 1]} : vector<1x256xf32> to vector<1x64xf32>
    %47 = arith.negf %46 : vector<1x64xf32>
    %48 = math.exp %47 : vector<1x64xf32>
    %cst_12 = arith.constant 1.000000e+00 : f32
    %49 = vector.broadcast %cst_12 : f32 to vector<1x64xf32>
    %50 = arith.addf %49, %48 : vector<1x64xf32>
    %51 = arith.divf %49, %50 : vector<1x64xf32>
    %52 = arith.mulf %43, %28 : vector<1x64xf32>
    %53 = arith.mulf %37, %45 : vector<1x64xf32>
    %54 = arith.addf %52, %53 : vector<1x64xf32>
    %55 = math.tanh %54 : vector<1x64xf32>
    %56 = arith.mulf %51, %55 : vector<1x64xf32>
    %57 = vector.extract_strided_slice %56 {offsets = [0, 0], sizes = [1, 32], strides = [1, 1]} : vector<1x64xf32> to vector<1x32xf32>
    %58 = vector.extract_strided_slice %56 {offsets = [0, 32], sizes = [1, 32], strides = [1, 1]} : vector<1x64xf32> to vector<1x32xf32>
    %59 = vector.extract_strided_slice %26 {offsets = [1, 0], sizes = [1, 256], strides = [1, 1]} : vector<8x256xf32> to vector<1x256xf32>
    %cst_13 = arith.constant dense<0.000000e+00> : vector<1x256xf32>
    %60 = tpu.matmul %56, %3, %cst_13 {dimension_numbers = #tpu.dot_dimension_numbers<[1], [0], [0], [1], [0, 0, 1, 1], [], []>} : vector<1x64xf32>, vector<64x256xf32>, vector<1x256xf32> -> vector<1x256xf32>
    %61 = arith.addf %59, %60 : vector<1x256xf32>
    %62 = vector.extract_strided_slice %61 {offsets = [0, 0], sizes = [1, 64], strides = [1, 1]} : vector<1x256xf32> to vector<1x64xf32>
    %63 = arith.negf %62 : vector<1x64xf32>
    %64 = math.exp %63 : vector<1x64xf32>
    %cst_14 = arith.constant 1.000000e+00 : f32
    %65 = vector.broadcast %cst_14 : f32 to vector<1x64xf32>
    %66 = arith.addf %65, %64 : vector<1x64xf32>
    %67 = arith.divf %65, %66 : vector<1x64xf32>
    %68 = vector.extract_strided_slice %61 {offsets = [0, 64], sizes = [1, 64], strides = [1, 1]} : vector<1x256xf32> to vector<1x64xf32>
    %69 = arith.negf %68 : vector<1x64xf32>
    %70 = math.exp %69 : vector<1x64xf32>
    %cst_15 = arith.constant 1.000000e+00 : f32
    %71 = vector.broadcast %cst_15 : f32 to vector<1x64xf32>
    %72 = arith.addf %71, %70 : vector<1x64xf32>
    %73 = arith.divf %71, %72 : vector<1x64xf32>
    %74 = vector.extract_strided_slice %61 {offsets = [0, 128], sizes = [1, 64], strides = [1, 1]} : vector<1x256xf32> to vector<1x64xf32>
    %75 = math.tanh %74 : vector<1x64xf32>
    %76 = vector.extract_strided_slice %61 {offsets = [0, 192], sizes = [1, 64], strides = [1, 1]} : vector<1x256xf32> to vector<1x64xf32>
    %77 = arith.negf %76 : vector<1x64xf32>
    %78 = math.exp %77 : vector<1x64xf32>
    %cst_16 = arith.constant 1.000000e+00 : f32
    %79 = vector.broadcast %cst_16 : f32 to vector<1x64xf32>
    %80 = arith.addf %79, %78 : vector<1x64xf32>
    %81 = arith.divf %79, %80 : vector<1x64xf32>
    %82 = arith.mulf %73, %54 : vector<1x64xf32>
    %83 = arith.mulf %67, %75 : vector<1x64xf32>
    %84 = arith.addf %82, %83 : vector<1x64xf32>
    %85 = math.tanh %84 : vector<1x64xf32>
    %86 = arith.mulf %81, %85 : vector<1x64xf32>
    %87 = vector.extract_strided_slice %86 {offsets = [0, 0], sizes = [1, 32], strides = [1, 1]} : vector<1x64xf32> to vector<1x32xf32>
    %88 = vector.extract_strided_slice %86 {offsets = [0, 32], sizes = [1, 32], strides = [1, 1]} : vector<1x64xf32> to vector<1x32xf32>
    %89 = vector.extract_strided_slice %26 {offsets = [2, 0], sizes = [1, 256], strides = [1, 1]} : vector<8x256xf32> to vector<1x256xf32>
    %cst_17 = arith.constant dense<0.000000e+00> : vector<1x256xf32>
    %90 = tpu.matmul %86, %3, %cst_17 {dimension_numbers = #tpu.dot_dimension_numbers<[1], [0], [0], [1], [0, 0, 1, 1], [], []>} : vector<1x64xf32>, vector<64x256xf32>, vector<1x256xf32> -> vector<1x256xf32>
    %91 = arith.addf %89, %90 : vector<1x256xf32>
    %92 = vector.extract_strided_slice %91 {offsets = [0, 0], sizes = [1, 64], strides = [1, 1]} : vector<1x256xf32> to vector<1x64xf32>
    %93 = arith.negf %92 : vector<1x64xf32>
    %94 = math.exp %93 : vector<1x64xf32>
    %cst_18 = arith.constant 1.000000e+00 : f32
    %95 = vector.broadcast %cst_18 : f32 to vector<1x64xf32>
    %96 = arith.addf %95, %94 : vector<1x64xf32>
    %97 = arith.divf %95, %96 : vector<1x64xf32>
    %98 = vector.extract_strided_slice %91 {offsets = [0, 64], sizes = [1, 64], strides = [1, 1]} : vector<1x256xf32> to vector<1x64xf32>
    %99 = arith.negf %98 : vector<1x64xf32>
    %100 = math.exp %99 : vector<1x64xf32>
    %cst_19 = arith.constant 1.000000e+00 : f32
    %101 = vector.broadcast %cst_19 : f32 to vector<1x64xf32>
    %102 = arith.addf %101, %100 : vector<1x64xf32>
    %103 = arith.divf %101, %102 : vector<1x64xf32>
    %104 = vector.extract_strided_slice %91 {offsets = [0, 128], sizes = [1, 64], strides = [1, 1]} : vector<1x256xf32> to vector<1x64xf32>
    %105 = math.tanh %104 : vector<1x64xf32>
    %106 = vector.extract_strided_slice %91 {offsets = [0, 192], sizes = [1, 64], strides = [1, 1]} : vector<1x256xf32> to vector<1x64xf32>
    %107 = arith.negf %106 : vector<1x64xf32>
    %108 = math.exp %107 : vector<1x64xf32>
    %cst_20 = arith.constant 1.000000e+00 : f32
    %109 = vector.broadcast %cst_20 : f32 to vector<1x64xf32>
    %110 = arith.addf %109, %108 : vector<1x64xf32>
    %111 = arith.divf %109, %110 : vector<1x64xf32>
    %112 = arith.mulf %103, %84 : vector<1x64xf32>
    %113 = arith.mulf %97, %105 : vector<1x64xf32>
    %114 = arith.addf %112, %113 : vector<1x64xf32>
    %115 = math.tanh %114 : vector<1x64xf32>
    %116 = arith.mulf %111, %115 : vector<1x64xf32>
    %117 = vector.extract_strided_slice %116 {offsets = [0, 0], sizes = [1, 32], strides = [1, 1]} : vector<1x64xf32> to vector<1x32xf32>
    %118 = vector.extract_strided_slice %116 {offsets = [0, 32], sizes = [1, 32], strides = [1, 1]} : vector<1x64xf32> to vector<1x32xf32>
    %119 = vector.extract_strided_slice %26 {offsets = [3, 0], sizes = [1, 256], strides = [1, 1]} : vector<8x256xf32> to vector<1x256xf32>
    %cst_21 = arith.constant dense<0.000000e+00> : vector<1x256xf32>
    %120 = tpu.matmul %116, %3, %cst_21 {dimension_numbers = #tpu.dot_dimension_numbers<[1], [0], [0], [1], [0, 0, 1, 1], [], []>} : vector<1x64xf32>, vector<64x256xf32>, vector<1x256xf32> -> vector<1x256xf32>
    %121 = arith.addf %119, %120 : vector<1x256xf32>
    %122 = vector.extract_strided_slice %121 {offsets = [0, 0], sizes = [1, 64], strides = [1, 1]} : vector<1x256xf32> to vector<1x64xf32>
    %123 = arith.negf %122 : vector<1x64xf32>
    %124 = math.exp %123 : vector<1x64xf32>
    %cst_22 = arith.constant 1.000000e+00 : f32
    %125 = vector.broadcast %cst_22 : f32 to vector<1x64xf32>
    %126 = arith.addf %125, %124 : vector<1x64xf32>
    %127 = arith.divf %125, %126 : vector<1x64xf32>
    %128 = vector.extract_strided_slice %121 {offsets = [0, 64], sizes = [1, 64], strides = [1, 1]} : vector<1x256xf32> to vector<1x64xf32>
    %129 = arith.negf %128 : vector<1x64xf32>
    %130 = math.exp %129 : vector<1x64xf32>
    %cst_23 = arith.constant 1.000000e+00 : f32
    %131 = vector.broadcast %cst_23 : f32 to vector<1x64xf32>
    %132 = arith.addf %131, %130 : vector<1x64xf32>
    %133 = arith.divf %131, %132 : vector<1x64xf32>
    %134 = vector.extract_strided_slice %121 {offsets = [0, 128], sizes = [1, 64], strides = [1, 1]} : vector<1x256xf32> to vector<1x64xf32>
    %135 = math.tanh %134 : vector<1x64xf32>
    %136 = vector.extract_strided_slice %121 {offsets = [0, 192], sizes = [1, 64], strides = [1, 1]} : vector<1x256xf32> to vector<1x64xf32>
    %137 = arith.negf %136 : vector<1x64xf32>
    %138 = math.exp %137 : vector<1x64xf32>
    %cst_24 = arith.constant 1.000000e+00 : f32
    %139 = vector.broadcast %cst_24 : f32 to vector<1x64xf32>
    %140 = arith.addf %139, %138 : vector<1x64xf32>
    %141 = arith.divf %139, %140 : vector<1x64xf32>
    %142 = arith.mulf %133, %114 : vector<1x64xf32>
    %143 = arith.mulf %127, %135 : vector<1x64xf32>
    %144 = arith.addf %142, %143 : vector<1x64xf32>
    %145 = math.tanh %144 : vector<1x64xf32>
    %146 = arith.mulf %141, %145 : vector<1x64xf32>
    %147 = vector.extract_strided_slice %146 {offsets = [0, 0], sizes = [1, 32], strides = [1, 1]} : vector<1x64xf32> to vector<1x32xf32>
    %148 = vector.extract_strided_slice %146 {offsets = [0, 32], sizes = [1, 32], strides = [1, 1]} : vector<1x64xf32> to vector<1x32xf32>
    %149 = vector.extract_strided_slice %26 {offsets = [4, 0], sizes = [1, 256], strides = [1, 1]} : vector<8x256xf32> to vector<1x256xf32>
    %cst_25 = arith.constant dense<0.000000e+00> : vector<1x256xf32>
    %150 = tpu.matmul %146, %3, %cst_25 {dimension_numbers = #tpu.dot_dimension_numbers<[1], [0], [0], [1], [0, 0, 1, 1], [], []>} : vector<1x64xf32>, vector<64x256xf32>, vector<1x256xf32> -> vector<1x256xf32>
    %151 = arith.addf %149, %150 : vector<1x256xf32>
    %152 = vector.extract_strided_slice %151 {offsets = [0, 0], sizes = [1, 64], strides = [1, 1]} : vector<1x256xf32> to vector<1x64xf32>
    %153 = arith.negf %152 : vector<1x64xf32>
    %154 = math.exp %153 : vector<1x64xf32>
    %cst_26 = arith.constant 1.000000e+00 : f32
    %155 = vector.broadcast %cst_26 : f32 to vector<1x64xf32>
    %156 = arith.addf %155, %154 : vector<1x64xf32>
    %157 = arith.divf %155, %156 : vector<1x64xf32>
    %158 = vector.extract_strided_slice %151 {offsets = [0, 64], sizes = [1, 64], strides = [1, 1]} : vector<1x256xf32> to vector<1x64xf32>
    %159 = arith.negf %158 : vector<1x64xf32>
    %160 = math.exp %159 : vector<1x64xf32>
    %cst_27 = arith.constant 1.000000e+00 : f32
    %161 = vector.broadcast %cst_27 : f32 to vector<1x64xf32>
    %162 = arith.addf %161, %160 : vector<1x64xf32>
    %163 = arith.divf %161, %162 : vector<1x64xf32>
    %164 = vector.extract_strided_slice %151 {offsets = [0, 128], sizes = [1, 64], strides = [1, 1]} : vector<1x256xf32> to vector<1x64xf32>
    %165 = math.tanh %164 : vector<1x64xf32>
    %166 = vector.extract_strided_slice %151 {offsets = [0, 192], sizes = [1, 64], strides = [1, 1]} : vector<1x256xf32> to vector<1x64xf32>
    %167 = arith.negf %166 : vector<1x64xf32>
    %168 = math.exp %167 : vector<1x64xf32>
    %cst_28 = arith.constant 1.000000e+00 : f32
    %169 = vector.broadcast %cst_28 : f32 to vector<1x64xf32>
    %170 = arith.addf %169, %168 : vector<1x64xf32>
    %171 = arith.divf %169, %170 : vector<1x64xf32>
    %172 = arith.mulf %163, %144 : vector<1x64xf32>
    %173 = arith.mulf %157, %165 : vector<1x64xf32>
    %174 = arith.addf %172, %173 : vector<1x64xf32>
    %175 = math.tanh %174 : vector<1x64xf32>
    %176 = arith.mulf %171, %175 : vector<1x64xf32>
    %177 = vector.extract_strided_slice %176 {offsets = [0, 0], sizes = [1, 32], strides = [1, 1]} : vector<1x64xf32> to vector<1x32xf32>
    %178 = vector.extract_strided_slice %176 {offsets = [0, 32], sizes = [1, 32], strides = [1, 1]} : vector<1x64xf32> to vector<1x32xf32>
    %179 = vector.extract_strided_slice %26 {offsets = [5, 0], sizes = [1, 256], strides = [1, 1]} : vector<8x256xf32> to vector<1x256xf32>
    %cst_29 = arith.constant dense<0.000000e+00> : vector<1x256xf32>
    %180 = tpu.matmul %176, %3, %cst_29 {dimension_numbers = #tpu.dot_dimension_numbers<[1], [0], [0], [1], [0, 0, 1, 1], [], []>} : vector<1x64xf32>, vector<64x256xf32>, vector<1x256xf32> -> vector<1x256xf32>
    %181 = arith.addf %179, %180 : vector<1x256xf32>
    %182 = vector.extract_strided_slice %181 {offsets = [0, 0], sizes = [1, 64], strides = [1, 1]} : vector<1x256xf32> to vector<1x64xf32>
    %183 = arith.negf %182 : vector<1x64xf32>
    %184 = math.exp %183 : vector<1x64xf32>
    %cst_30 = arith.constant 1.000000e+00 : f32
    %185 = vector.broadcast %cst_30 : f32 to vector<1x64xf32>
    %186 = arith.addf %185, %184 : vector<1x64xf32>
    %187 = arith.divf %185, %186 : vector<1x64xf32>
    %188 = vector.extract_strided_slice %181 {offsets = [0, 64], sizes = [1, 64], strides = [1, 1]} : vector<1x256xf32> to vector<1x64xf32>
    %189 = arith.negf %188 : vector<1x64xf32>
    %190 = math.exp %189 : vector<1x64xf32>
    %cst_31 = arith.constant 1.000000e+00 : f32
    %191 = vector.broadcast %cst_31 : f32 to vector<1x64xf32>
    %192 = arith.addf %191, %190 : vector<1x64xf32>
    %193 = arith.divf %191, %192 : vector<1x64xf32>
    %194 = vector.extract_strided_slice %181 {offsets = [0, 128], sizes = [1, 64], strides = [1, 1]} : vector<1x256xf32> to vector<1x64xf32>
    %195 = math.tanh %194 : vector<1x64xf32>
    %196 = vector.extract_strided_slice %181 {offsets = [0, 192], sizes = [1, 64], strides = [1, 1]} : vector<1x256xf32> to vector<1x64xf32>
    %197 = arith.negf %196 : vector<1x64xf32>
    %198 = math.exp %197 : vector<1x64xf32>
    %cst_32 = arith.constant 1.000000e+00 : f32
    %199 = vector.broadcast %cst_32 : f32 to vector<1x64xf32>
    %200 = arith.addf %199, %198 : vector<1x64xf32>
    %201 = arith.divf %199, %200 : vector<1x64xf32>
    %202 = arith.mulf %193, %174 : vector<1x64xf32>
    %203 = arith.mulf %187, %195 : vector<1x64xf32>
    %204 = arith.addf %202, %203 : vector<1x64xf32>
    %205 = math.tanh %204 : vector<1x64xf32>
    %206 = arith.mulf %201, %205 : vector<1x64xf32>
    %207 = vector.extract_strided_slice %206 {offsets = [0, 0], sizes = [1, 32], strides = [1, 1]} : vector<1x64xf32> to vector<1x32xf32>
    %208 = vector.extract_strided_slice %206 {offsets = [0, 32], sizes = [1, 32], strides = [1, 1]} : vector<1x64xf32> to vector<1x32xf32>
    %209 = vector.extract_strided_slice %26 {offsets = [6, 0], sizes = [1, 256], strides = [1, 1]} : vector<8x256xf32> to vector<1x256xf32>
    %cst_33 = arith.constant dense<0.000000e+00> : vector<1x256xf32>
    %210 = tpu.matmul %206, %3, %cst_33 {dimension_numbers = #tpu.dot_dimension_numbers<[1], [0], [0], [1], [0, 0, 1, 1], [], []>} : vector<1x64xf32>, vector<64x256xf32>, vector<1x256xf32> -> vector<1x256xf32>
    %211 = arith.addf %209, %210 : vector<1x256xf32>
    %212 = vector.extract_strided_slice %211 {offsets = [0, 0], sizes = [1, 64], strides = [1, 1]} : vector<1x256xf32> to vector<1x64xf32>
    %213 = arith.negf %212 : vector<1x64xf32>
    %214 = math.exp %213 : vector<1x64xf32>
    %cst_34 = arith.constant 1.000000e+00 : f32
    %215 = vector.broadcast %cst_34 : f32 to vector<1x64xf32>
    %216 = arith.addf %215, %214 : vector<1x64xf32>
    %217 = arith.divf %215, %216 : vector<1x64xf32>
    %218 = vector.extract_strided_slice %211 {offsets = [0, 64], sizes = [1, 64], strides = [1, 1]} : vector<1x256xf32> to vector<1x64xf32>
    %219 = arith.negf %218 : vector<1x64xf32>
    %220 = math.exp %219 : vector<1x64xf32>
    %cst_35 = arith.constant 1.000000e+00 : f32
    %221 = vector.broadcast %cst_35 : f32 to vector<1x64xf32>
    %222 = arith.addf %221, %220 : vector<1x64xf32>
    %223 = arith.divf %221, %222 : vector<1x64xf32>
    %224 = vector.extract_strided_slice %211 {offsets = [0, 128], sizes = [1, 64], strides = [1, 1]} : vector<1x256xf32> to vector<1x64xf32>
    %225 = math.tanh %224 : vector<1x64xf32>
    %226 = vector.extract_strided_slice %211 {offsets = [0, 192], sizes = [1, 64], strides = [1, 1]} : vector<1x256xf32> to vector<1x64xf32>
    %227 = arith.negf %226 : vector<1x64xf32>
    %228 = math.exp %227 : vector<1x64xf32>
    %cst_36 = arith.constant 1.000000e+00 : f32
    %229 = vector.broadcast %cst_36 : f32 to vector<1x64xf32>
    %230 = arith.addf %229, %228 : vector<1x64xf32>
    %231 = arith.divf %229, %230 : vector<1x64xf32>
    %232 = arith.mulf %223, %204 : vector<1x64xf32>
    %233 = arith.mulf %217, %225 : vector<1x64xf32>
    %234 = arith.addf %232, %233 : vector<1x64xf32>
    %235 = math.tanh %234 : vector<1x64xf32>
    %236 = arith.mulf %231, %235 : vector<1x64xf32>
    %237 = vector.extract_strided_slice %236 {offsets = [0, 0], sizes = [1, 32], strides = [1, 1]} : vector<1x64xf32> to vector<1x32xf32>
    %238 = vector.extract_strided_slice %236 {offsets = [0, 32], sizes = [1, 32], strides = [1, 1]} : vector<1x64xf32> to vector<1x32xf32>
    %239 = vector.extract_strided_slice %26 {offsets = [7, 0], sizes = [1, 256], strides = [1, 1]} : vector<8x256xf32> to vector<1x256xf32>
    %cst_37 = arith.constant dense<0.000000e+00> : vector<1x256xf32>
    %240 = tpu.matmul %236, %3, %cst_37 {dimension_numbers = #tpu.dot_dimension_numbers<[1], [0], [0], [1], [0, 0, 1, 1], [], []>} : vector<1x64xf32>, vector<64x256xf32>, vector<1x256xf32> -> vector<1x256xf32>
    %241 = arith.addf %239, %240 : vector<1x256xf32>
    %242 = vector.extract_strided_slice %241 {offsets = [0, 0], sizes = [1, 64], strides = [1, 1]} : vector<1x256xf32> to vector<1x64xf32>
    %243 = arith.negf %242 : vector<1x64xf32>
    %244 = math.exp %243 : vector<1x64xf32>
    %cst_38 = arith.constant 1.000000e+00 : f32
    %245 = vector.broadcast %cst_38 : f32 to vector<1x64xf32>
    %246 = arith.addf %245, %244 : vector<1x64xf32>
    %247 = arith.divf %245, %246 : vector<1x64xf32>
    %248 = vector.extract_strided_slice %241 {offsets = [0, 64], sizes = [1, 64], strides = [1, 1]} : vector<1x256xf32> to vector<1x64xf32>
    %249 = arith.negf %248 : vector<1x64xf32>
    %250 = math.exp %249 : vector<1x64xf32>
    %cst_39 = arith.constant 1.000000e+00 : f32
    %251 = vector.broadcast %cst_39 : f32 to vector<1x64xf32>
    %252 = arith.addf %251, %250 : vector<1x64xf32>
    %253 = arith.divf %251, %252 : vector<1x64xf32>
    %254 = vector.extract_strided_slice %241 {offsets = [0, 128], sizes = [1, 64], strides = [1, 1]} : vector<1x256xf32> to vector<1x64xf32>
    %255 = math.tanh %254 : vector<1x64xf32>
    %256 = vector.extract_strided_slice %241 {offsets = [0, 192], sizes = [1, 64], strides = [1, 1]} : vector<1x256xf32> to vector<1x64xf32>
    %257 = arith.negf %256 : vector<1x64xf32>
    %258 = math.exp %257 : vector<1x64xf32>
    %cst_40 = arith.constant 1.000000e+00 : f32
    %259 = vector.broadcast %cst_40 : f32 to vector<1x64xf32>
    %260 = arith.addf %259, %258 : vector<1x64xf32>
    %261 = arith.divf %259, %260 : vector<1x64xf32>
    %262 = arith.mulf %253, %234 : vector<1x64xf32>
    %263 = arith.mulf %247, %255 : vector<1x64xf32>
    %264 = arith.addf %262, %263 : vector<1x64xf32>
    %265 = math.tanh %264 : vector<1x64xf32>
    %266 = arith.mulf %261, %265 : vector<1x64xf32>
    %267 = vector.extract_strided_slice %266 {offsets = [0, 0], sizes = [1, 32], strides = [1, 1]} : vector<1x64xf32> to vector<1x32xf32>
    %268 = vector.extract_strided_slice %266 {offsets = [0, 32], sizes = [1, 32], strides = [1, 1]} : vector<1x64xf32> to vector<1x32xf32>
    %269 = tpu.concatenate %57, %87, %117, %147, %177, %207, %237, %267 in 0 : vector<1x32xf32>, vector<1x32xf32>, vector<1x32xf32>, vector<1x32xf32>, vector<1x32xf32>, vector<1x32xf32>, vector<1x32xf32>, vector<1x32xf32> -> vector<8x32xf32>
    %270 = tpu.concatenate %268, %238, %208, %178, %148, %118, %88, %58 in 0 : vector<1x32xf32>, vector<1x32xf32>, vector<1x32xf32>, vector<1x32xf32>, vector<1x32xf32>, vector<1x32xf32>, vector<1x32xf32>, vector<1x32xf32> -> vector<8x32xf32>
    %271 = tpu.concatenate %269, %270 in 1 : vector<8x32xf32>, vector<8x32xf32> -> vector<8x64xf32>
    %c0_41 = arith.constant 0 : index
    %c0_42 = arith.constant 0 : index
    %272 = vector.load %arg4[%c0_41, %c0_42] : memref<64x4xf32, #tpu.memory_space<vmem>>, vector<64x4xf32>
    %cst_43 = arith.constant dense<0.000000e+00> : vector<8x4xf32>
    %273 = tpu.matmul %271, %272, %cst_43 {dimension_numbers = #tpu.dot_dimension_numbers<[1], [0], [0], [1], [0, 0, 1, 1], [], []>} : vector<8x64xf32>, vector<64x4xf32>, vector<8x4xf32> -> vector<8x4xf32>
    %c0_44 = arith.constant 0 : index
    %c0_45 = arith.constant 0 : index
    %274 = vector.load %arg5[%c0_44, %c0_45] : memref<1x4xf32, #tpu.memory_space<vmem>>, vector<1x4xf32>
    %275 = vector.broadcast %274 : vector<1x4xf32> to vector<8x4xf32>
    %276 = arith.addf %273, %275 : vector<8x4xf32>
    %c0_46 = arith.constant 0 : index
    %c0_47 = arith.constant 0 : index
    %277 = vector.load %arg6[%c0_46, %c0_47] : memref<8x4xf32, #tpu.memory_space<vmem>>, vector<8x4xf32>
    tpu.vector_store %arg6[%c0_46, %c0_47], %276 {strides = array<i32>} : memref<8x4xf32, #tpu.memory_space<vmem>>, vector<8x4xf32>,
    return
  }
}

</mosaic_0001>

<bundles_post_ra>
// kernel: lstm_classifier_forward.1
= control target key start
LH: loop header
LB: loop body
LE: loop exit
PB: predicated region body
PF: predicated region fallthrough
CT: control target
= control target key end

     0   :  { %11 = vsyncpa [#allocation3], 0  ;;  %s1526_s21 = smov [#allocation2]   ;;  %s1829_s0 = inlined_call_operand.vmem [shape: f32[8,16], index: 0, kind: input, shape index: {}]   ;;  %s1830_s1 = inlined_call_operand.vmem [shape: f32[16,256], index: 1, kind: input, shape index: {}]   ;;  %s1831_s2 = inlined_call_operand.vmem [shape: f32[1,256], index: 2, kind: input, shape index: {}]   ;;  %s1832_s3 = inlined_call_operand.hbm [shape: f32[64,256], index: 3, kind: input, shape index: {}]   ;;  %s1833_s4 = inlined_call_operand.vmem [shape: f32[64,4], index: 4, kind: input, shape index: {}]   ;;  %s1834_s5 = inlined_call_operand.vmem [shape: f32[1,4], index: 5, kind: input, shape index: {}]   ;;  %s1835_s6 = inlined_call_operand.vmem [shape: f32[8,4], index: 6, kind: output, shape index: {}]  }
   0x1   :  { %s23_s22 = sshll.u32 %s1526_s21, 4  ;;  %s1502_s25 = scalar_lea.hbm %s1832_s3, 2048  ;;  %s24_s22 = int_to_ptr.vmem [resolvable:$true] %s23_s22 }
   0x2   :  { %p1503_p0 = scmp.ne.s32.totalorder %s1832_s3, %s1502_s25  ;;  %p1506_p1 = scmp.lt.u32.totalorder %s1502_s25, %s1832_s3 }
   0x4   :  { %p1508_p2 = pnand %p1506_p1, %p1503_p0 }
   0x6   :  { %1511 = shalt.err (!%p1508_p2)
}
   0x7   :  { %s1512_s30 = scalar_lea.vmem %s24_s22, 2048  ;;  %p1517_p4 = scmp.lt.s32.totalorder %s24_s22, %s24_s22 }
   0x8   :  { %p1513_p3 = scmp.ne.s32.totalorder %s24_s22, %s1512_s30  ;;  %p1518_p5 = scmp.lt.s32.totalorder %s1512_s30, %s1512_s30 }
   0xa   :  { %p1519_p6 = por %p1518_p5, %p1517_p4 }
   0xc   :  { %p1520_p7 = pnand %p1519_p6, %p1513_p3 }
   0xe   :  { %1523 = shalt.err (!%p1520_p7)
}
   0xf   :  { %s1527_s7 = smov 256   ;;  %s1528_s8 = smov 16  }
  0x10   :  { %29 = dma.hbm_to_vmem [thread:$0]  %s1832_s3, 2048, %s24_s22, [#allocation3], %s1527_s7, %s1527_s7, %s1528_s8  }
  0x11   :  { %1524 = dma.done.wait [#allocation3], 2048  }
  0x12   :  { %1525 = vsyncadd [#allocation3], 4294965248  ;;  %v1529_v0 = vmov 0.0   ;;  %v39_v1 = vld [vmem:[%s1830_s1 + $0x8] sm:$0xff]  ;;  %v41_v2 = vld [vmem:[%s1830_s1 + $0x18] sm:$0xff]  ;;  %vm70_vm0 = vcmask 130048   ;;  %v60_v32 = vlaneseq }
  0x13   :  { %138 = vmatprep.mubr.f32.mxu0 %v1529_v0  ;;  %264 = vmatprep.mubr.f32.mxu1 %v1529_v0  ;;  %v38_v3 = vld [vmem:[%s1830_s1] sm:$0xff]  ;;  %v1253_v4 = vpack.c.bf16 %v41_v2, %v39_v1  ;;  %v40_v5 = vld [vmem:[%s1830_s1 + $0x10] sm:$0xff]  ;;  %v44_v6 = vld [vmem:[#allocation2 + $0x8] sm:$0xff]  ;;  %vm154_vm1 = vcmask 1040384   ;;  %vm156_vm2 = vcmask 1041408   ;;  %vm158_vm3 = vcmask 1042432  }
  0x14   :  { %v1255_v7 = vpack.c.bf16 %v40_v5, %v38_v3  ;;  %v37_v8 = vld [vmem:[%s1829_s0] sm:$0xff]  ;;  %v46_v9 = vld [vmem:[#allocation2 + $0x18] sm:$0xff]  ;;  %v45_v11 = vld [vmem:[#allocation2 + $0x10] sm:$0xff]  ;;  %v61_v33 = vshrl.u32 %v60_v32, 7  ;;  %vm160_vm4 = vcmask 1043456   ;;  %vm162_vm5 = vcmask 1044480  }
  0x15   :  { %v43_v10 = vld [vmem:[#allocation2] sm:$0xff]  ;;  %1254 = vmatprep.subr.bf16.mxu0 %v1253_v4  ;;  %v1599_v12 = vpack.c.bf16 %v46_v9, %v44_v6  ;;  %v48_v14 = vld [vmem:[#allocation2 + $0x28] sm:$0xff]  ;;  %v50_v15 = vld [vmem:[#allocation2 + $0x38] sm:$0xff]  ;;  %vm164_vm6 = vcmask 1045504   ;;  %vm166_vm7 = vcmask 1046528   ;;  %s1531_s20 = smov 32  }
  0x16   :  { %v1601_v13 = vpack.c.bf16 %v45_v11, %v43_v10  ;;  %v47_v16 = vld [vmem:[#allocation2 + $0x20] sm:$0xff]  ;;  %1256 = vmatpush1.bf16.msra.mxu0 %v1255_v7  ;;  %v1603_v17 = vpack.c.bf16 %v50_v15, %v48_v14  ;;  %v49_v18 = vld [vmem:[#allocation2 + $0x30] sm:$0xff]  ;;  %v52_v19 = vld [vmem:[#allocation2 + $0x48] sm:$0xff]  ;;  %v66_v34 = vsub.s32 1, %v61_v33  ;;  %v62_v45 = vsub.s32 0, %v61_v33  ;;  %s1532_s21 = smov 96  }
  0x17   :  { %v54_v20 = vld [vmem:[#allocation2 + $0x58] sm:$0xff]  ;;  %1258 = vmatprep.subr.bf16.mxu1 %v1599_v12  ;;  %1274 = vmatprep.subr.bf16.mxu0 %v1599_v12  ;;  %v1608_v21 = vpack.c.bf16 %v49_v18, %v47_v16  ;;  %v51_v23 = vld [vmem:[#allocation2 + $0x40] sm:$0xff]  ;;  %v53_v24 = vld [vmem:[#allocation2 + $0x50] sm:$0xff]  ;;  %vm188_vm8 = vcmask 261120   ;;  %vm190_vm9 = vcmask 523264   ;;  %vm192_vm10 = vcmask 785408  }
  0x18   :  { %1260 = vmatpush1.bf16.msra.mxu1 %v1601_v13  ;;  %v1611_v22 = vpack.c.bf16 %v54_v20, %v52_v19  ;;  %v56_v25 = vld [vmem:[#allocation2 + $0x68] sm:$0xff]  ;;  %v58_v26 = vld [vmem:[#allocation2 + $0x78] sm:$0xff]  ;;  %v1617_v27 = vpack.c.bf16 %v53_v24, %v51_v23  ;;  %v55_v29 = vld [vmem:[#allocation2 + $0x60] sm:$0xff]  ;;  %vm1534_vm11 = vmmov 0   ;;  %vm1192_vm12 = vcmask 31744  }
  0x19   :  { %1199 = vmatmul.mubr.msk.f32.vlgmr.msra.gmra.mrb[0].mxu0 %vm70_vm0, %v37_v8  ;;  %1262 = vmatprep.subr.bf16.mxu1 %v1603_v17  ;;  %v1620_v28 = vpack.c.bf16 %v58_v26, %v56_v25  ;;  %v57_v30 = vld [vmem:[#allocation2 + $0x70] sm:$0xff]  ;;  %v42_v35 = vld [vmem:[%s1831_s2] sm:$0x3]  ;;  %s1530_s2 = smov 64  }
  0x1a   :  { %1276 = vmatpush1.bf16.msra.mxu0 %v1601_v13  ;;  %364 = vmatprep.mubr.f32.mxu0 %v1529_v0  ;;  %v1625_v31 = vpack.c.bf16 %v57_v30, %v55_v29  ;;  %v67_v36 = vrot.slane %v42_v35, %v66_v34  ;;  %v63_v50 = vrot.slane %v42_v35, %v62_v45 }
  0x1b   :  { %1278 = vmatprep.subr.bf16.mxu0 %v1603_v17 }
  0x1c   :  { %1264 = vmatpush1.bf16.msra.mxu1 %v1608_v21 }
  0x1d   :  { %1266 = vmatprep.subr.bf16.mxu1 %v1611_v22 }
  0x1e   :  { %1280 = vmatpush1.bf16.msra.mxu0 %v1608_v21 }
  0x1f   :  { %1282 = vmatprep.subr.bf16.mxu0 %v1611_v22 }
  0x20   :  { %1268 = vmatpush1.bf16.msra.mxu1 %v1617_v27 }
  0x21   :  { %1270 = vmatprep.subr.bf16.mxu1 %v1620_v28 }
  0x22   :  { %1284 = vmatpush1.bf16.msra.mxu0 %v1617_v27 }
  0x23   :  { %1286 = vmatprep.subr.bf16.mxu0 %v1620_v28 }
  0x24   :  { %1272 = vmatpush1.bf16.msra.mxu1 %v1625_v31 }
  0x25   :  { %1290 = vmatprep.subr.bf16.mxu1 %v1599_v12 }
  0x26   :  { %1288 = vmatpush1.bf16.msra.mxu0 %v1625_v31 }
  0x27   :  { %265 = vmatmul.mubr.f32.vlgmr.msra.gmra.mrb[0].mxu1 %v1529_v0  ;;  %1306 = vmatprep.subr.bf16.mxu0 %v1599_v12 }
  0x28   :  { %1292 = vmatpush1.bf16.msra.mxu1 %v1601_v13  ;;  %474 = vmatprep.mubr.f32.mxu1 %v1529_v0 }
  0x29   :  { %1294 = vmatprep.subr.bf16.mxu1 %v1603_v17 }
  0x2c   :  { %1296 = vmatpush1.bf16.msra.mxu1 %v1608_v21 }
  0x2d   :  { %1298 = vmatprep.subr.bf16.mxu1 %v1611_v22 }
  0x30   :  { %1300 = vmatpush1.bf16.msra.mxu1 %v1617_v27 }
  0x31   :  { %1302 = vmatprep.subr.bf16.mxu1 %v1620_v28 }
  0x34   :  { %1304 = vmatpush1.bf16.msra.mxu1 %v1625_v31 }
  0x35   :  { %1322 = vmatprep.subr.bf16.mxu1 %v1599_v12 }
  0xec   :  { %v140_v37 = vpop.f32.mrb[0].mxu0 }
  0xed   :  { %v142_v38 = vpop.f32.mrb[1].mxu0  ;;  %v141_v54 = vadd.f32 %v140_v37, %v63_v50 }
  0xee   :  { %v143_v39 = vadd.f32 %v142_v38, %v67_v36 }
  0xf0   :  { %v146_v40 = vrot.slane %v143_v39, 7  ;;  %v148_v41 = vrot.slane %v143_v39, 5  ;;  %v150_v42 = vrot.slane %v143_v39, 3  ;;  %v152_v44 = vrot.slane %v143_v39, 1 }
  0xf2   :  { %v155_v43 = vsel %vm154_vm1, %v146_v40, %v148_v41 }
  0xf3   :  { %v157_v46 = vsel %vm156_vm2, %v155_v43, %v150_v42 }
  0xf4   :  { %v159_v47 = vsel %vm158_vm3, %v157_v46, %v152_v44 }
  0xf5   :  { %v161_v48 = vsel %vm160_vm4, %v159_v47, %v146_v40 }
  0xf6   :  { %v163_v49 = vsel %vm162_vm5, %v161_v48, %v148_v41 }
  0xf7   :  { %v165_v51 = vsel %vm164_vm6, %v163_v49, %v150_v42 }
  0xf8   :  { %v167_v52 = vsel %vm166_vm7, %v165_v51, %v152_v44 }
  0xf9   :  { %176 = vrot.lane.b32.xlu1 %v167_v52, %s1530_s2  ;;  %169 = vrot.lane.b32.xlu0 %v167_v52, %s1531_s20 }
  0xfa   :  { %v266_v53 = vpop.f32.mrb[0].mxu1 }
  0xfb   :  { %v268_v55 = vpop.f32.mrb[1].mxu1 }
  0xfd   :  { %179 = vrot.lane.b32.xlu1 %v141_v54, %s1530_s2  ;;  %173 = vrot.lane.b32.xlu0 %v141_v54, %s1531_s20 }
 0x101   :  { %185 = vrot.lane.b32.xlu1 %v141_v54, %s1532_s21  ;;  %182 = vrot.lane.b32.xlu0 %v167_v52, %s1532_s21 }
 0x16b   :  { %v177_v56 = vpop.permute.xlu1 %176  ;;  %v170_v57 = vpop.permute.xlu0 %169 }
 0x16c   :  { %v189_v58 = vsel %vm188_vm8, %v141_v54, %v170_v57 }
 0x16f   :  { %v180_v59 = vpop.permute.xlu1 %179  ;;  %v174_v60 = vpop.permute.xlu0 %173 }
 0x170   :  { %v191_v61 = vsel %vm190_vm9, %v189_v58, %v174_v60 }
 0x171   :  { %v1658_v62 = vsel %vm192_vm10, %v191_v61, %v177_v56 }
 0x172   :  { %v271_v63 = vadd.f32 %v266_v53, %v1658_v62 }
 0x173   :  { %v183_v1 = vpop.permute.xlu0 %182  ;;  %v186_v3 = vpop.permute.xlu1 %185 }
 0x174   :  { %v1200_v2 = vmul.f32 -1.442695, %v271_v63  ;;  %v194_v4 = vsel %vm188_vm8, %v180_v59, %v183_v1 }
 0x175   :  { %v195_v5 = vsel %vm190_vm9, %v194_v4, %v186_v3 }
 0x176   :  { %1406 = vpow2.f32 %v1200_v2  ;;  %v1663_v6 = vsel %vm192_vm10, %v195_v5, %v167_v52 }
 0x177   :  { %v272_v7 = vadd.f32 %v268_v55, %v1663_v6 }
 0x179   :  { %1408 = vtanh.f32 %v272_v7  ;;  %v1201_v15 = vmul.f32 -1.442695, %v272_v7 }
 0x180   :  { %v1407_v8 = vpop.eup %1406 }
 0x181   :  { %v276_v9 = vadd.f32 1.0, %v1407_v8 }
 0x183   :  { %1410 = vrcp.f32 %v276_v9  ;;  %v1409_v10 = vpop.eup %1408 }
 0x184   :  { %1412 = vpow2.f32 %v1201_v15 }
 0x18d   :  { %v1411_v11 = vpop.eup %1410 }
 0x18e   :  { %v287_v14 = vmul.f32 %v1411_v11, %v1409_v10  ;;  %v1413_v16 = vpop.eup %1412  ;;  %v286_v19 = vmul.f32 0.0, %v1411_v11 }
 0x18f   :  { %v283_v18 = vadd.f32 1.0, %v1413_v16 }
 0x190   :  { %289 = vrot.lane.b32.xlu0 %v287_v14, %s1530_s2 }
 0x191   :  { %1414 = vrcp.f32 %v283_v18 }
 0x19b   :  { %v1415_v24 = vpop.eup %1414 }
 0x202   :  { %v290_v20 = vpop.permute.xlu0 %289 }
 0x203   :  { %v292_v23 = vadd.f32 %v290_v20, %v286_v19 }
 0x205   :  { %1416 = vtanh.f32 %v292_v23  ;;  %v393_v41 = vrot.slane %v292_v23, 7 }
 0x20f   :  { %v1417_v25 = vpop.eup %1416 }
 0x210   :  { %v1667_v26 = vmul.f32 %v1417_v25, %v1415_v24 }
 0x212   :  { %296 = vrot.lane.b32.xlu1 %v1667_v26, %s1530_s2 }
 0x284   :  { %v297_v29 = vpop.permute.xlu1 %296 }
 0x285   :  { %1202 = vmatmul.mubr.msk.f32.vlgmr.msra.gmra.mrb[2].mxu0 %vm190_vm9, %v297_v29 }
 0x286   :  { %1308 = vmatpush1.bf16.msra.mxu0 %v1601_v13  ;;  %584 = vmatprep.mubr.f32.mxu0 %v1529_v0 }
 0x287   :  { %1310 = vmatprep.subr.bf16.mxu0 %v1603_v17 }
 0x28a   :  { %1312 = vmatpush1.bf16.msra.mxu0 %v1608_v21 }
 0x28b   :  { %1314 = vmatprep.subr.bf16.mxu0 %v1611_v22 }
 0x28e   :  { %1316 = vmatpush1.bf16.msra.mxu0 %v1617_v27 }
 0x28f   :  { %1318 = vmatprep.subr.bf16.mxu0 %v1620_v28 }
 0x292   :  { %1320 = vmatpush1.bf16.msra.mxu0 %v1625_v31 }
 0x293   :  { %1338 = vmatprep.subr.bf16.mxu0 %v1599_v12 }
 0x358   :  { %v366_v30 = vpop.f32.mrb[2].mxu0 }
 0x359   :  { %v373_v32 = vrot.slane %v366_v30, 7  ;;  %v368_v33 = vpop.f32.mrb[3].mxu0 }
 0x35a   :  { %v374_v36 = vrot.slane %v368_v33, 7 }
 0x35b   :  { %v377_v34 = vadd.f32 %v373_v32, %v1658_v62 }
 0x35c   :  { %v378_v37 = vadd.f32 %v374_v36, %v1663_v6 }
 0x35d   :  { %v1203_v35 = vmul.f32 -1.442695, %v377_v34 }
 0x35e   :  { %v1204_v45 = vmul.f32 -1.442695, %v378_v37 }
 0x35f   :  { %1418 = vpow2.f32 %v1203_v35 }
 0x360   :  { %1420 = vtanh.f32 %v378_v37 }
 0x369   :  { %v1419_v38 = vpop.eup %1418 }
 0x36a   :  { %v382_v39 = vadd.f32 1.0, %v1419_v38  ;;  %v1421_v40 = vpop.eup %1420 }
 0x36c   :  { %1422 = vrcp.f32 %v382_v39 }
 0x36d   :  { %1424 = vpow2.f32 %v1204_v45 }
 0x376   :  { %v1423_v42 = vpop.eup %1422 }
 0x377   :  { %v396_v43 = vmul.f32 %v1423_v42, %v1421_v40  ;;  %v395_v44 = vmul.f32 %v1423_v42, %v393_v41  ;;  %v1425_v46 = vpop.eup %1424 }
 0x378   :  { %v389_v47 = vadd.f32 1.0, %v1425_v46 }
 0x379   :  { %398 = vrot.lane.b32.xlu0 %v396_v43, %s1530_s2 }
 0x37a   :  { %1426 = vrcp.f32 %v389_v47 }
 0x384   :  { %v1427_v50 = vpop.eup %1426 }
 0x3eb   :  { %v399_v48 = vpop.permute.xlu0 %398 }
 0x3ec   :  { %v401_v49 = vadd.f32 %v399_v48, %v395_v44 }
 0x3ee   :  { %1428 = vtanh.f32 %v401_v49  ;;  %v503_v3 = vrot.slane %v401_v49, 7 }
 0x3f8   :  { %v1429_v51 = vpop.eup %1428 }
 0x3f9   :  { %v1684_v52 = vmul.f32 %v1429_v51, %v1427_v50 }
 0x3fb   :  { %v405_v53 = vrot.slane %v1684_v52, 1  ;;  %v1064_v19 = vsel %vm154_vm1, %v1667_v26, %v1684_v52 }
 0x3fd   :  { %406 = vrot.lane.b32.xlu1 %v405_v53, %s1530_s2 }
 0x46f   :  { %v407_v54 = vpop.permute.xlu1 %406 }
 0x470   :  { %1205 = vmatmul.mubr.msk.f32.vlgmr.msra.gmra.mrb[2].mxu1 %vm190_vm9, %v407_v54 }
 0x471   :  { %1324 = vmatpush1.bf16.msra.mxu1 %v1601_v13  ;;  %694 = vmatprep.mubr.f32.mxu1 %v1529_v0 }
 0x472   :  { %1326 = vmatprep.subr.bf16.mxu1 %v1603_v17 }
 0x475   :  { %1328 = vmatpush1.bf16.msra.mxu1 %v1608_v21 }
 0x476   :  { %1330 = vmatprep.subr.bf16.mxu1 %v1611_v22 }
 0x479   :  { %1332 = vmatpush1.bf16.msra.mxu1 %v1617_v27 }
 0x47a   :  { %1334 = vmatprep.subr.bf16.mxu1 %v1620_v28 }
 0x47d   :  { %1336 = vmatpush1.bf16.msra.mxu1 %v1625_v31 }
 0x47e   :  { %1354 = vmatprep.subr.bf16.mxu1 %v1599_v12 }
 0x543   :  { %v476_v55 = vpop.f32.mrb[2].mxu1 }
 0x544   :  { %v483_v56 = vrot.slane %v476_v55, 6  ;;  %v478_v57 = vpop.f32.mrb[3].mxu1 }
 0x545   :  { %v484_v60 = vrot.slane %v478_v57, 6 }
 0x546   :  { %v487_v58 = vadd.f32 %v483_v56, %v1658_v62 }
 0x547   :  { %v488_v61 = vadd.f32 %v484_v60, %v1663_v6 }
 0x548   :  { %v1206_v59 = vmul.f32 -1.442695, %v487_v58 }
 0x549   :  { %v1207_v8 = vmul.f32 -1.442695, %v488_v61 }
 0x54a   :  { %1430 = vpow2.f32 %v1206_v59 }
 0x54b   :  { %1432 = vtanh.f32 %v488_v61 }
 0x554   :  { %v1431_v63 = vpop.eup %1430 }
 0x555   :  { %v492_v1 = vadd.f32 1.0, %v1431_v63  ;;  %v1433_v2 = vpop.eup %1432 }
 0x557   :  { %1434 = vrcp.f32 %v492_v1 }
 0x558   :  { %1436 = vpow2.f32 %v1207_v8 }
 0x561   :  { %v1435_v4 = vpop.eup %1434 }
 0x562   :  { %v506_v5 = vmul.f32 %v1435_v4, %v1433_v2  ;;  %v505_v7 = vmul.f32 %v1435_v4, %v503_v3  ;;  %v1437_v9 = vpop.eup %1436 }
 0x563   :  { %v499_v10 = vadd.f32 1.0, %v1437_v9 }
 0x564   :  { %508 = vrot.lane.b32.xlu0 %v506_v5, %s1530_s2 }
 0x565   :  { %1438 = vrcp.f32 %v499_v10 }
 0x56f   :  { %v1439_v15 = vpop.eup %1438 }
 0x5d6   :  { %v509_v11 = vpop.permute.xlu0 %508 }
 0x5d7   :  { %v511_v14 = vadd.f32 %v509_v11, %v505_v7 }
 0x5d9   :  { %1440 = vtanh.f32 %v511_v14  ;;  %v613_v39 = vrot.slane %v511_v14, 7 }
 0x5e3   :  { %v1441_v16 = vpop.eup %1440 }
 0x5e4   :  { %v1701_v18 = vmul.f32 %v1441_v16, %v1439_v15 }
 0x5e6   :  { %v515_v20 = vrot.slane %v1701_v18, 2  ;;  %v1065_v23 = vsel %vm156_vm2, %v1064_v19, %v1701_v18 }
 0x5e8   :  { %516 = vrot.lane.b32.xlu1 %v515_v20, %s1530_s2 }
 0x65a   :  { %v517_v24 = vpop.permute.xlu1 %516 }
 0x65b   :  { %1208 = vmatmul.mubr.msk.f32.vlgmr.msra.gmra.mrb[4].mxu0 %vm190_vm9, %v517_v24 }
 0x65c   :  { %1340 = vmatpush1.bf16.msra.mxu0 %v1601_v13  ;;  %804 = vmatprep.mubr.f32.mxu0 %v1529_v0 }
 0x65d   :  { %1342 = vmatprep.subr.bf16.mxu0 %v1603_v17 }
 0x660   :  { %1344 = vmatpush1.bf16.msra.mxu0 %v1608_v21 }
 0x661   :  { %1346 = vmatprep.subr.bf16.mxu0 %v1611_v22 }
 0x664   :  { %1348 = vmatpush1.bf16.msra.mxu0 %v1617_v27 }
 0x665   :  { %1350 = vmatprep.subr.bf16.mxu0 %v1620_v28 }
 0x668   :  { %1352 = vmatpush1.bf16.msra.mxu0 %v1625_v31 }
 0x669   :  { %1370 = vmatprep.subr.bf16.mxu0 %v1599_v12 }
 0x72e   :  { %v586_v25 = vpop.f32.mrb[4].mxu0 }
 0x72f   :  { %v593_v29 = vrot.slane %v586_v25, 5  ;;  %v588_v30 = vpop.f32.mrb[5].mxu0 }
 0x730   :  { %v594_v34 = vrot.slane %v588_v30, 5 }
 0x731   :  { %v597_v32 = vadd.f32 %v593_v29, %v1658_v62 }
 0x732   :  { %v598_v35 = vadd.f32 %v594_v34, %v1663_v6 }
 0x733   :  { %v1209_v33 = vmul.f32 -1.442695, %v597_v32 }
 0x734   :  { %v1210_v12 = vmul.f32 -1.442695, %v598_v35 }
 0x735   :  { %1442 = vpow2.f32 %v1209_v33 }
 0x736   :  { %1444 = vtanh.f32 %v598_v35 }
 0x73f   :  { %v1443_v36 = vpop.eup %1442 }
 0x740   :  { %v602_v37 = vadd.f32 1.0, %v1443_v36  ;;  %v1445_v38 = vpop.eup %1444 }
 0x742   :  { %1446 = vrcp.f32 %v602_v37 }
 0x743   :  { %1448 = vpow2.f32 %v1210_v12 }
 0x74c   :  { %v1447_v40 = vpop.eup %1446 }
 0x74d   :  { %v616_v41 = vmul.f32 %v1447_v40, %v1445_v38  ;;  %v615_v42 = vmul.f32 %v1447_v40, %v613_v39  ;;  %v1449_v43 = vpop.eup %1448 }
 0x74e   :  { %v609_v44 = vadd.f32 1.0, %v1449_v43 }
 0x74f   :  { %618 = vrot.lane.b32.xlu0 %v616_v41, %s1530_s2 }
 0x750   :  { %1450 = vrcp.f32 %v609_v44 }
 0x75a   :  { %v1451_v47 = vpop.eup %1450 }
 0x7c1   :  { %v619_v45 = vpop.permute.xlu0 %618 }
 0x7c2   :  { %v621_v46 = vadd.f32 %v619_v45, %v615_v42 }
 0x7c4   :  { %1452 = vtanh.f32 %v621_v46  ;;  %v723_v2 = vrot.slane %v621_v46, 7 }
 0x7ce   :  { %v1453_v48 = vpop.eup %1452 }
 0x7cf   :  { %v1723_v49 = vmul.f32 %v1453_v48, %v1451_v47 }
 0x7d1   :  { %v625_v50 = vrot.slane %v1723_v49, 3  ;;  %v1066_v51 = vsel %vm158_vm3, %v1065_v23, %v1723_v49 }
 0x7d3   :  { %626 = vrot.lane.b32.xlu1 %v625_v50, %s1530_s2 }
 0x845   :  { %v627_v53 = vpop.permute.xlu1 %626 }
 0x846   :  { %1211 = vmatmul.mubr.msk.f32.vlgmr.msra.gmra.mrb[4].mxu1 %vm190_vm9, %v627_v53 }
 0x847   :  { %1356 = vmatpush1.bf16.msra.mxu1 %v1601_v13  ;;  %914 = vmatprep.mubr.f32.mxu1 %v1529_v0 }
 0x848   :  { %1358 = vmatprep.subr.bf16.mxu1 %v1603_v17 }
 0x84b   :  { %1360 = vmatpush1.bf16.msra.mxu1 %v1608_v21 }
 0x84c   :  { %1362 = vmatprep.subr.bf16.mxu1 %v1611_v22 }
 0x84f   :  { %1364 = vmatpush1.bf16.msra.mxu1 %v1617_v27 }
 0x850   :  { %1366 = vmatprep.subr.bf16.mxu1 %v1620_v28 }
 0x853   :  { %1368 = vmatpush1.bf16.msra.mxu1 %v1625_v31 }
 0x919   :  { %v696_v54 = vpop.f32.mrb[4].mxu1 }
 0x91a   :  { %v703_v55 = vrot.slane %v696_v54, 4  ;;  %v698_v56 = vpop.f32.mrb[5].mxu1 }
 0x91b   :  { %v704_v59 = vrot.slane %v698_v56, 4 }
 0x91c   :  { %v707_v57 = vadd.f32 %v703_v55, %v1658_v62 }
 0x91d   :  { %v708_v60 = vadd.f32 %v704_v59, %v1663_v6 }
 0x91e   :  { %v1212_v58 = vmul.f32 -1.442695, %v707_v57 }
 0x91f   :  { %v1213_v7 = vmul.f32 -1.442695, %v708_v60 }
 0x920   :  { %1454 = vpow2.f32 %v1212_v58 }
 0x921   :  { %1456 = vtanh.f32 %v708_v60 }
 0x92a   :  { %v1455_v61 = vpop.eup %1454 }
 0x92b   :  { %v712_v63 = vadd.f32 1.0, %v1455_v61  ;;  %v1457_v1 = vpop.eup %1456 }
 0x92d   :  { %1458 = vrcp.f32 %v712_v63 }
 0x92e   :  { %1460 = vpow2.f32 %v1213_v7 }
 0x937   :  { %v1459_v3 = vpop.eup %1458 }
 0x938   :  { %v726_v4 = vmul.f32 %v1459_v3, %v1457_v1  ;;  %v725_v5 = vmul.f32 %v1459_v3, %v723_v2  ;;  %v1461_v8 = vpop.eup %1460 }
 0x939   :  { %v719_v9 = vadd.f32 1.0, %v1461_v8 }
 0x93a   :  { %728 = vrot.lane.b32.xlu0 %v726_v4, %s1530_s2 }
 0x93b   :  { %1462 = vrcp.f32 %v719_v9 }
 0x945   :  { %v1463_v14 = vpop.eup %1462 }
 0x9ac   :  { %v729_v10 = vpop.permute.xlu0 %728 }
 0x9ad   :  { %v731_v11 = vadd.f32 %v729_v10, %v725_v5 }
 0x9af   :  { %1464 = vtanh.f32 %v731_v11 }
 0x9b9   :  { %v1465_v15 = vpop.eup %1464 }
 0x9ba   :  { %v1741_v16 = vmul.f32 %v1465_v15, %v1463_v14 }
 0x9bc   :  { %v735_v19 = vrot.slane %v1741_v16, 4  ;;  %v1067_v20 = vsel %vm160_vm4, %v1066_v51, %v1741_v16 }
 0x9be   :  { %736 = vrot.lane.b32.xlu1 %v735_v19, %s1530_s2 }
 0xa30   :  { %v737_v23 = vpop.permute.xlu1 %736 }
 0xa31   :  { %1214 = vmatmul.mubr.msk.f32.vlgmr.msra.gmra.mrb[6].mxu0 %vm190_vm9, %v737_v23 }
 0xa32   :  { %1372 = vmatpush1.bf16.msra.mxu0 %v1601_v13  ;;  %1024 = vmatprep.mubr.f32.mxu0 %v1529_v0 }
 0xa33   :  { %1374 = vmatprep.subr.bf16.mxu0 %v1603_v17 }
 0xa36   :  { %1376 = vmatpush1.bf16.msra.mxu0 %v1608_v21 }
 0xa37   :  { %1378 = vmatprep.subr.bf16.mxu0 %v1611_v22 }
 0xa3a   :  { %1380 = vmatpush1.bf16.msra.mxu0 %v1617_v27  ;;  %v833_v27 = vrot.slane %v731_v11, 7 }
 0xa3b   :  { %1382 = vmatprep.subr.bf16.mxu0 %v1620_v28 }
 0xa3e   :  { %1384 = vmatpush1.bf16.msra.mxu0 %v1625_v31 }
 0xb04   :  { %v806_v24 = vpop.f32.mrb[6].mxu0 }
 0xb05   :  { %v813_v25 = vrot.slane %v806_v24, 3  ;;  %v808_v29 = vpop.f32.mrb[7].mxu0 }
 0xb06   :  { %v814_v32 = vrot.slane %v808_v29, 3 }
 0xb07   :  { %v817_v30 = vadd.f32 %v813_v25, %v1658_v62 }
 0xb08   :  { %v818_v17 = vadd.f32 %v814_v32, %v1663_v6 }
 0xb09   :  { %v1215_v13 = vmul.f32 -1.442695, %v817_v30 }
 0xb0a   :  { %v1216_v31 = vmul.f32 -1.442695, %v818_v17 }
 0xb0b   :  { %1466 = vpow2.f32 %v1215_v13 }
 0xb0c   :  { %1468 = vtanh.f32 %v818_v17 }
 0xb15   :  { %v1467_v33 = vpop.eup %1466 }
 0xb16   :  { %v822_v21 = vadd.f32 1.0, %v1467_v33  ;;  %v1469_v22 = vpop.eup %1468 }
 0xb18   :  { %1470 = vrcp.f32 %v822_v21  ;;  %v1105_v21 = vld [vmem:[%s1833_s4 + $0x8] sm:$0xff] }
 0xb19   :  { %1472 = vpow2.f32 %v1216_v31 }
 0xb22   :  { %v1471_v34 = vpop.eup %1470 }
 0xb23   :  { %v836_v28 = vmul.f32 %v1471_v34, %v1469_v22  ;;  %v835_v35 = vmul.f32 %v1471_v34, %v833_v27  ;;  %v1473_v36 = vpop.eup %1472  ;;  %v1533_v22 = vmov 0.0|0.0   ;;  %v1107_v34 = vld [vmem:[%s1833_s4 + $0x18] sm:$0xff] }
 0xb24   :  { %v829_v37 = vadd.f32 1.0, %v1473_v36  ;;  %1385 = vmatprep.subr.bf16.mxu1 %v1533_v22 }
 0xb25   :  { %838 = vrot.lane.b32.xlu0 %v836_v28, %s1530_s2 }
 0xb26   :  { %1474 = vrcp.f32 %v829_v37 }
 0xb30   :  { %v1475_v40 = vpop.eup %1474 }
 0xb97   :  { %v839_v38 = vpop.permute.xlu0 %838 }
 0xb98   :  { %v841_v39 = vadd.f32 %v839_v38, %v835_v35 }
 0xb9a   :  { %1476 = vtanh.f32 %v841_v39  ;;  %v943_v57 = vrot.slane %v841_v39, 7  ;;  %v1108_v39 = vld [vmem:[%s1833_s4 + $0x20] sm:$0xff] }
 0xba4   :  { %v1477_v41 = vpop.eup %1476 }
 0xba5   :  { %v1759_v42 = vmul.f32 %v1477_v41, %v1475_v40  ;;  %v1109_v40 = vld [vmem:[%s1833_s4 + $0x28] sm:$0xff]  ;;  %v1110_v41 = vld [vmem:[%s1833_s4 + $0x30] sm:$0xff] }
 0xba7   :  { %v845_v12 = vrot.slane %v1759_v42, 5  ;;  %v1068_v43 = vsel %vm162_vm5, %v1067_v20, %v1759_v42 }
 0xba9   :  { %846 = vrot.lane.b32.xlu1 %v845_v12, %s1530_s2  ;;  %v1392_v12 = vpack.c.bf16 %v1109_v40, %v1108_v39 }
 0xc1b   :  { %v847_v44 = vpop.permute.xlu1 %846 }
 0xc1c   :  { %1217 = vmatmul.mubr.msk.f32.vlgmr.msra.gmra.mrb[6].mxu1 %vm190_vm9, %v847_v44 }
 0xc1d   :  { %1250 = vmatprep.mubr.msk.f32.mxu1 %vm1534_vm11, %v1529_v0  ;;  %v1082_v0 = vrot.slane %v1701_v18, 5 }
 0xcef   :  { %v916_v45 = vpop.f32.mrb[6].mxu1 }
 0xcf0   :  { %v923_v46 = vrot.slane %v916_v45, 2  ;;  %v918_v47 = vpop.f32.mrb[7].mxu1 }
 0xcf1   :  { %v924_v51 = vrot.slane %v918_v47, 2 }
 0xcf2   :  { %v927_v48 = vadd.f32 %v923_v46, %v1658_v62 }
 0xcf3   :  { %v928_v53 = vadd.f32 %v924_v51, %v1663_v6 }
 0xcf4   :  { %v1218_v50 = vmul.f32 -1.442695, %v927_v48 }
 0xcf5   :  { %v1219_v61 = vmul.f32 -1.442695, %v928_v53 }
 0xcf6   :  { %1478 = vpow2.f32 %v1218_v50 }
 0xcf7   :  { %1480 = vtanh.f32 %v928_v53  ;;  %v1076_v53 = vrot.slane %v1759_v42, 3  ;;  %v1086_v42 = vrot.slane %v1667_v26, 1 }
 0xd00   :  { %v1479_v54 = vpop.eup %1478 }
 0xd01   :  { %v932_v55 = vadd.f32 1.0, %v1479_v54  ;;  %v1481_v56 = vpop.eup %1480  ;;  %v1078_v54 = vrot.slane %v1741_v16, 1 }
 0xd03   :  { %1482 = vrcp.f32 %v932_v55 }
 0xd04   :  { %1484 = vpow2.f32 %v1219_v61 }
 0xd0d   :  { %v1483_v58 = vpop.eup %1482 }
 0xd0e   :  { %v946_v59 = vmul.f32 %v1483_v58, %v1481_v56  ;;  %v945_v60 = vmul.f32 %v1483_v58, %v943_v57  ;;  %v1485_v63 = vpop.eup %1484  ;;  %v1080_v56 = vrot.slane %v1723_v49, 7 }
 0xd0f   :  { %v939_v1 = vadd.f32 1.0, %v1485_v63 }
 0xd10   :  { %948 = vrot.lane.b32.xlu0 %v946_v59, %s1530_s2  ;;  %v1084_v59 = vrot.slane %v1684_v52, 3  ;;  %v1223_v52 = vld [vmem:[%s1834_s5] ss:$0 sm:$0xff] }
 0xd11   :  { %1486 = vrcp.f32 %v939_v1 }
 0xd1b   :  { %v1487_v4 = vpop.eup %1486 }
 0xd82   :  { %v949_v2 = vpop.permute.xlu0 %948 }
 0xd83   :  { %v951_v3 = vadd.f32 %v949_v2, %v945_v60 }
 0xd85   :  { %1488 = vtanh.f32 %v951_v3  ;;  %v1053_v13 = vrot.slane %v951_v3, 7 }
 0xd8f   :  { %v1489_v5 = vpop.eup %1488 }
 0xd90   :  { %v1769_v7 = vmul.f32 %v1489_v5, %v1487_v4 }
 0xd92   :  { %v955_v8 = vrot.slane %v1769_v7, 6  ;;  %v1069_v9 = vsel %vm164_vm6, %v1068_v43, %v1769_v7  ;;  %v1111_v43 = vld [vmem:[%s1833_s4 + $0x38] sm:$0xff]  ;;  %v1074_v48 = vrot.slane %v1769_v7, 5 }
 0xd93   :  { %v1395_v44 = vpack.c.bf16 %v1111_v43, %v1110_v41 }
 0xd94   :  { %956 = vrot.lane.b32.xlu1 %v955_v8, %s1530_s2 }
 0xe06   :  { %v957_v10 = vpop.permute.xlu1 %956 }
 0xe07   :  { %1220 = vmatmul.mubr.msk.f32.vlgmr.msra.gmra.mrb[8].mxu0 %vm190_vm9, %v957_v10 }
 0xeda   :  { %v1026_v11 = vpop.f32.mrb[8].mxu0 }
 0xedb   :  { %v1033_v14 = vrot.slane %v1026_v11, 1  ;;  %v1028_v15 = vpop.f32.mrb[9].mxu0 }
 0xedc   :  { %v1034_v23 = vrot.slane %v1028_v15, 1 }
 0xedd   :  { %v1037_v19 = vadd.f32 %v1033_v14, %v1658_v62  ;;  %v1104_v62 = vld [vmem:[%s1833_s4] sm:$0xff] }
 0xede   :  { %v1038_v24 = vadd.f32 %v1034_v23, %v1663_v6  ;;  %v1106_v6 = vld [vmem:[%s1833_s4 + $0x10] sm:$0xff]  ;;  %v1386_v27 = vpack.c.bf16 %v1105_v21, %v1104_v62 }
 0xedf   :  { %v1221_v20 = vmul.f32 -1.442695, %v1037_v19  ;;  %v1389_v28 = vpack.c.bf16 %v1107_v34, %v1106_v6 }
 0xee0   :  { %1387 = vmatpush3.bf16.msra.mxu1 %v1386_v27  ;;  %v1222_v35 = vmul.f32 -1.442695, %v1038_v24 }
 0xee1   :  { %1490 = vpow2.f32 %v1221_v20  ;;  %1388 = vmatprep.subr.bf16.mxu1 %v1533_v22 }
 0xee2   :  { %1492 = vtanh.f32 %v1038_v24 }
 0xee4   :  { %1390 = vmatpush3.bf16.msra.mxu1 %v1389_v28 }
 0xee5   :  { %1391 = vmatprep.subr.bf16.mxu1 %v1533_v22 }
 0xee8   :  { %1393 = vmatpush3.bf16.msra.mxu1 %v1392_v12 }
 0xee9   :  { %1394 = vmatprep.subr.bf16.mxu1 %v1533_v22 }
 0xeeb   :  { %v1491_v25 = vpop.eup %1490 }
 0xeec   :  { %v1042_v29 = vadd.f32 1.0, %v1491_v25  ;;  %v1493_v30 = vpop.eup %1492  ;;  %1396 = vmatpush3.bf16.msra.mxu1 %v1395_v44 }
 0xeee   :  { %1494 = vrcp.f32 %v1042_v29 }
 0xeef   :  { %1496 = vpow2.f32 %v1222_v35 }
 0xef8   :  { %v1495_v32 = vpop.eup %1494 }
 0xef9   :  { %v1056_v17 = vmul.f32 %v1495_v32, %v1493_v30  ;;  %v1055_v33 = vmul.f32 %v1495_v32, %v1053_v13  ;;  %v1497_v31 = vpop.eup %1496 }
 0xefa   :  { %v1049_v36 = vadd.f32 1.0, %v1497_v31 }
 0xefb   :  { %1058 = vrot.lane.b32.xlu0 %v1056_v17, %s1530_s2 }
 0xefc   :  { %1498 = vrcp.f32 %v1049_v36 }
 0xf06   :  { %v1499_v45 = vpop.eup %1498 }
 0xf6d   :  { %v1059_v37 = vpop.permute.xlu0 %1058 }
 0xf6e   :  { %v1061_v38 = vadd.f32 %v1059_v37, %v1055_v33 }
 0xf70   :  { %1500 = vtanh.f32 %v1061_v38 }
 0xf7a   :  { %v1501_v46 = vpop.eup %1500 }
 0xf7b   :  { %v1063_v47 = vmul.f32 %v1501_v46, %v1499_v45 }
 0xf7d   :  { %v1070_v50 = vsel %vm166_vm7, %v1069_v9, %v1063_v47  ;;  %v1072_v51 = vrot.slane %v1063_v47, 7 }
 0xf7e   :  { %1096 = vrot.lane.b32.xlu1 %v1070_v50, %s1530_s2 }
 0xf7f   :  { %v1088_v55 = vsel %vm154_vm1, %v1072_v51, %v1074_v48 }
 0xf80   :  { %v1089_v57 = vsel %vm156_vm2, %v1088_v55, %v1076_v53 }
 0xf81   :  { %v1090_v58 = vsel %vm158_vm3, %v1089_v57, %v1078_v54 }
 0xf82   :  { %v1091_v60 = vsel %vm160_vm4, %v1090_v58, %v1080_v56 }
 0xf83   :  { %v1092_v61 = vsel %vm162_vm5, %v1091_v60, %v1082_v0 }
 0xf84   :  { %v1093_v16 = vsel %vm164_vm6, %v1092_v61, %v1084_v59 }
 0xf85   :  { %v1094_v63 = vsel %vm166_vm7, %v1093_v16, %v1086_v42 }
 0xf86   :  { %1100 = vrot.lane.b32.xlu0 %v1094_v63, %s1530_s2 }
 0xff0   :  { %v1097_v49 = vpop.permute.xlu1 %1096 }
 0xff8   :  { %v1101_v1 = vpop.permute.xlu0 %1100 }
 0xff9   :  { %v1103_v18 = vsel %vm188_vm8, %v1097_v49, %v1101_v1 }
 0xffa   :  { %1251 = vmatmul.mubr.msk.f32.vlgmr.msra.gmra.mrb[8].mxu1 %vm190_vm9, %v1103_v18 }
0x10cd   :  { %v1188_v2 = vpop.f32.mrb[8].mxu1 }
0x10ce   :  { %v1189_v26 = vadd.f32 %v1223_v52, %v1188_v2  ;;  %v1252_v3 = vpop.f32.mrb[9].mxu1 }
0x10d0   :  { %1193 = vst.msk [vmem:[%s1835_s6] sm:$0xff] %vm1192_vm12, %v1189_v26 }
0x10d1   :  { %1198 = vsyncpa [#allocation3], 1 }

</bundles_post_ra>
